<compile_context>
chip_gen: v7x
topology: tpu7x:2x2x1
jax: 0.10.0
libtpu: 0.0.40
codegen_flags: <defaults>
</compile_context>

<pallas_src>
import functools

import jax
import jax.numpy as jnp
from jax import lax
from jax.experimental import pallas as pl
from jax.experimental.pallas import tpu as pltpu


# ----------------------------- arch settings ---------------------------------
ARCH_SETTINGS = {
    # k, exp_size, c, use_se, use_hs, spatial_stride
    "small": [
        [3, 16, 16, 1, 0, 2],
        [3, 72, 24, 0, 0, 2],
        [3, 88, 24, 0, 0, 1],
        [5, 96, 40, 1, 1, 2],
        [5, 240, 40, 1, 1, 1],
        [5, 240, 40, 1, 1, 1],
        [5, 120, 48, 1, 1, 1],
        [5, 144, 48, 1, 1, 1],
        [5, 288, 96, 1, 1, 2],
        [5, 576, 96, 1, 1, 1],
        [5, 576, 96, 1, 1, 1],
    ],
}


def make_divisible(v, divisor, min_value=None):
    if min_value is None:
        min_value = divisor
    new_v = max(min_value, int(v + divisor / 2) // divisor * divisor)
    if new_v < 0.9 * v:
        new_v += divisor
    return new_v


# ------------------------- fused activation epilogues -------------------------
def _apply_act(y, act):
    if act == "none":
        return y
    if act == "relu":
        return jnp.maximum(y, 0.0)
    if act == "hswish":                       # x * relu6(x + 3) / 6
        return y * (jnp.clip(y + 3.0, 0.0, 6.0) * (1.0 / 6.0))
    raise ValueError(act)


# ---------------- kernel 1: stem 1x3x3/s2 conv + temporal avg-pool + HSwish ---
def _stem_kernel(x_ref, w_ref, b_ref, o_ref):
    # x_ref: (1, 2, HW, 27) bf16 im2col of two consecutive frames
    w = w_ref[...]
    y0 = jnp.dot(x_ref[0, 0], w, preferred_element_type=jnp.float32)
    y1 = jnp.dot(x_ref[0, 1], w, preferred_element_type=jnp.float32)
    y = 0.5 * (y0 + y1) + b_ref[...]
    o_ref[0] = _apply_act(y, "hswish").astype(o_ref.dtype)


def _stem_forward(x, p):
    """x: (N, T, H, W, Cin) f32 -> (N*T2, Ho*Wo, C0) bf16 (AvgPool3d over T fused)."""
    N, T, H, W, Cin = x.shape
    Ho = (H + 2 - 3) // 2 + 1
    Wo = (W + 2 - 3) // 2 + 1
    xp = jnp.pad(x, ((0, 0), (0, 0), (1, 1), (1, 1), (0, 0)))
    views = []
    for kh in range(3):
        for kw in range(3):
            views.append(xp[:, :, kh:kh + 2 * Ho:2, kw:kw + 2 * Wo:2, :])
    xcol = jnp.concatenate(views, axis=-1).astype(jnp.bfloat16)   # (N,T,Ho,Wo,9*Cin)
    T2 = T // 2                                                   # AvgPool3d drops trailing odd frame
    HW = Ho * Wo
    Kc = 9 * Cin
    C0 = p["cout"]
    xcol = xcol[:, :2 * T2].reshape(N * T2, 2, HW, Kc)
    out = pl.pallas_call(
        _stem_kernel,
        out_shape=jax.ShapeDtypeStruct((N * T2, HW, C0), jnp.bfloat16),
        grid=(N * T2,),
        in_specs=[
            pl.BlockSpec((1, 2, HW, Kc), lambda i: (i, 0, 0, 0)),
            pl.BlockSpec((Kc, C0), lambda i: (0, 0)),
            pl.BlockSpec((1, C0), lambda i: (0, 0)),
        ],
        out_specs=pl.BlockSpec((1, HW, C0), lambda i: (i, 0, 0)),
        compiler_params=pltpu.CompilerParams(dimension_semantics=("parallel",)),
    )(xcol, p["w"], p["b"].reshape(1, C0))
    return out, (N, T2, Ho, Wo, C0)


# ---------------- kernel 2: flattened-M pointwise GEMM (expand convs) ---------
def _pw_kernel(x_ref, w_ref, b_ref, o_ref, *, act):
    y = jnp.dot(x_ref[...], w_ref[...], preferred_element_type=jnp.float32) + b_ref[...]
    o_ref[...] = _apply_act(y, act).astype(o_ref.dtype)


def pointwise_gemm(x2d, w, b, *, act, tm=512):
    """x2d: (M, Cin) bf16, w: (Cin, Cout) bf16, b: (Cout,) f32 -> (M, Cout) bf16."""
    M, Cin = x2d.shape
    Cout = w.shape[-1]
    tm = 512 if M >= 512 else ((M + 15) // 16) * 16
    Mp = ((M + tm - 1) // tm) * tm
    if Mp != M:
        x2d = jnp.pad(x2d, ((0, Mp - M), (0, 0)))
    out = pl.pallas_call(
        functools.partial(_pw_kernel, act=act),
        out_shape=jax.ShapeDtypeStruct((Mp, Cout), jnp.bfloat16),
        grid=(Mp // tm,),
        in_specs=[
            pl.BlockSpec((tm, Cin), lambda i: (i, 0)),
            pl.BlockSpec((Cin, Cout), lambda i: (0, 0)),   # resident weight
            pl.BlockSpec((1, Cout), lambda i: (0, 0)),
        ],
        out_specs=pl.BlockSpec((tm, Cout), lambda i: (i, 0)),
        compiler_params=pltpu.CompilerParams(dimension_semantics=("parallel",)),
    )(x2d, w, b.reshape(1, Cout))
    return out[:M] if Mp != M else out


# ---------------- kernel 3: depthwise 1xkxk spatial conv (strided, +BN, +act) -
def _dw_kernel(x_ref, w_ref, b_ref, o_ref, *rest, k, stride, Ho, Wo, act, with_mean):
    # x_ref: (1, stride, Hp, Wq, C) column-phase split padded frame (bf16)
    C = o_ref.shape[-1]

    def body(ho, msum):
        acc = jnp.zeros((1, Wo, C), jnp.float32)
        for kh in range(k):
            rows = [x_ref[0, r, pl.ds(stride * ho + kh, 1)].astype(jnp.float32)
                    for r in range(stride)]                    # each (1, Wq, C)
            for kw in range(k):
                r = kw % stride
                q = kw // stride
                acc = acc + rows[r][:, q:q + Wo, :] * w_ref[kh, kw:kw + 1, :]
        y = _apply_act(acc + b_ref[...], act)
        o_ref[0, pl.ds(ho, 1)] = y.astype(o_ref.dtype)
        if with_mean:
            return msum + jnp.sum(y, axis=1)                   # (1, C)
        return msum

    msum = lax.fori_loop(0, Ho, body, jnp.zeros((1, C), jnp.float32))
    if with_mean:
        rest[0][0] = msum * (1.0 / (Ho * Wo))


def depthwise_conv2d(x, w, b, *, stride, act, with_mean):
    """x: (NT, H, W, C) bf16; per-channel kxk conv with stride, folded BN + act.
    Optionally also returns per-frame channel means (for fused SE squeeze)."""
    NT, H, W, C = x.shape
    k = w.shape[0]
    p = (k - 1) // 2
    Ho = (H + 2 * p - k) // stride + 1
    Wo = (W + 2 * p - k) // stride + 1
    Wq = Wo + (k - 1) // stride
    Hp = H + 2 * p
    xp = jnp.pad(x, ((0, 0), (p, p), (p, p), (0, 0)))
    if stride == 1:
        xph = xp[:, None]                                      # (NT, 1, Hp, Wp, C)
    else:
        phases = []
        for r in range(stride):
            ph = xp[:, :, r::stride, :]
            if ph.shape[2] < Wq:
                ph = jnp.pad(ph, ((0, 0), (0, 0), (0, Wq - ph.shape[2]), (0, 0)))
            elif ph.shape[2] > Wq:
                ph = ph[:, :, :Wq, :]
            phases.append(ph)
        xph = jnp.stack(phases, axis=1)                        # (NT, stride, Hp, Wq, C)
    Wq = xph.shape[3]

    out_shapes = [jax.ShapeDtypeStruct((NT, Ho, Wo, C), jnp.bfloat16)]
    out_specs = [pl.BlockSpec((1, Ho, Wo, C), lambda n: (n, 0, 0, 0))]
    if with_mean:
        out_shapes.append(jax.ShapeDtypeStruct((NT, 1, C), jnp.float32))
        out_specs.append(pl.BlockSpec((1, 1, C), lambda n: (n, 0, 0)))

    res = pl.pallas_call(
        functools.partial(_dw_kernel, k=k, stride=stride, Ho=Ho, Wo=Wo, act=act,
                          with_mean=with_mean),
        out_shape=tuple(out_shapes) if with_mean else out_shapes[0],
        grid=(NT,),
        in_specs=[
            pl.BlockSpec((1, stride, Hp, Wq, C), lambda n: (n, 0, 0, 0, 0)),
            pl.BlockSpec((k, k, C), lambda n: (0, 0, 0)),
            pl.BlockSpec((1, C), lambda n: (0, 0)),
        ],
        out_specs=tuple(out_specs) if with_mean else out_specs[0],
        compiler_params=pltpu.CompilerParams(dimension_semantics=("parallel",)),
    )(xph, w, b.reshape(1, C))
    return res


# ---------------- kernel 4: kx1x1 temporal / 1x1x1 projection conv ------------
# Reads the kt shifted frames directly via index_map arithmetic (no stacked
# copies), holds the (kt, Cin, Cout) weight resident, and fuses: SE gating +
# activation on the input, bias, output activation, residual add and an
# optional per-frame mean output (for the head's SE squeeze).
def _tconv_kernel(*refs, kt, T, pt, gated, in_act, out_act, residual, with_mean):
    idx = 0
    x_refs = refs[idx:idx + kt]; idx += kt
    g_refs = None
    if gated:
        g_refs = refs[idx:idx + kt]; idx += kt
    w_ref = refs[idx]; b_ref = refs[idx + 1]; idx += 2
    skip_ref = None
    if residual:
        skip_ref = refs[idx]; idx += 1
    o_ref = refs[idx]; idx += 1
    m_ref = refs[idx] if with_mean else None

    HW = o_ref.shape[1]
    Cout = o_ref.shape[2]
    if kt > 1:
        t = pl.program_id(0) % T

    acc = jnp.zeros((HW, Cout), jnp.float32)
    for dt in range(kt):
        x = x_refs[dt][0]                                     # (HW, Cin) bf16
        if gated:
            xe = x.astype(jnp.float32) * g_refs[dt][0]        # per-frame SE gate
            xe = _apply_act(xe, in_act)
            xb = xe.astype(jnp.bfloat16)
        elif in_act != "none":
            xb = _apply_act(x.astype(jnp.float32), in_act).astype(jnp.bfloat16)
        else:
            xb = x.astype(jnp.bfloat16)
        contrib = jnp.dot(xb, w_ref[dt], preferred_element_type=jnp.float32)
        if kt > 1:                                            # zero-padding in T
            shifted = t + (dt - pt)
            mask = jnp.logical_and(shifted >= 0, shifted < T).astype(jnp.float32)
            contrib = contrib * mask
        acc = acc + contrib

    y = acc + b_ref[...]
    y = _apply_act(y, out_act)
    if residual:
        y = y + skip_ref[0].astype(jnp.float32)
    o_ref[0] = y.astype(o_ref.dtype)
    if with_mean:
        m_ref[0] = jnp.mean(y, axis=0, keepdims=True)


def frame_conv(x, w, b, *, T, act_in="none", act_out="none", gates=None, skip=None,
               with_mean=False, out_dtype=jnp.bfloat16):
    """x: (N*T, HW, Cin) bf16; w: (kt, Cin, Cout) bf16; b: (Cout,) f32.
    gates: optional (N*T, 1, Cin) f32; skip: optional (N*T, HW, Cout) bf16."""
    NT, HW, Cin = x.shape
    kt, _, Cout = w.shape
    pt = (kt - 1) // 2
    gated = gates is not None
    residual = skip is not None

    def make_xmap(dt):
        def xmap(i):
            n = i // T
            t = i - n * T
            tt = jnp.clip(t + dt - pt, 0, T - 1)
            return (n * T + tt, 0, 0)
        return xmap

    in_specs = [pl.BlockSpec((1, HW, Cin), make_xmap(dt)) for dt in range(kt)]
    inputs = [x] * kt
    if gated:
        in_specs += [pl.BlockSpec((1, 1, Cin), make_xmap(dt)) for dt in range(kt)]
        inputs += [gates] * kt
    in_specs += [pl.BlockSpec((kt, Cin, Cout), lambda i: (0, 0, 0)),
                 pl.BlockSpec((1, Cout), lambda i: (0, 0))]
    inputs += [w, b.reshape(1, Cout)]
    if residual:
        in_specs.append(pl.BlockSpec((1, HW, Cout), lambda i: (i, 0, 0)))
        inputs.append(skip)

    out_shapes = [jax.ShapeDtypeStruct((NT, HW, Cout), out_dtype)]
    out_specs = [pl.BlockSpec((1, HW, Cout), lambda i: (i, 0, 0))]
    if with_mean:
        out_shapes.append(jax.ShapeDtypeStruct((NT, 1, Cout), jnp.float32))
        out_specs.append(pl.BlockSpec((1, 1, Cout), lambda i: (i, 0, 0)))

    return pl.pallas_call(
        functools.partial(_tconv_kernel, kt=kt, T=T, pt=pt, gated=gated,
                          in_act=act_in, out_act=act_out, residual=residual,
                          with_mean=with_mean),
        out_shape=tuple(out_shapes) if with_mean else out_shapes[0],
        grid=(NT,),
        in_specs=in_specs,
        out_specs=tuple(out_specs) if with_mean else out_specs[0],
        compiler_params=pltpu.CompilerParams(dimension_semantics=("parallel",)),
    )(*inputs)


# ---------------- kernel 5: SE squeeze FCs (batched over all frames) ----------
def _se_gates_kernel(m_ref, w1_ref, b1_ref, w2_ref, b2_ref, g_ref):
    m = m_ref[...].astype(jnp.bfloat16)
    h = jnp.dot(m, w1_ref[...], preferred_element_type=jnp.float32) + b1_ref[...]
    h = jnp.maximum(h, 0.0)                                    # ReLU
    s = jnp.dot(h.astype(jnp.bfloat16), w2_ref[...],
                preferred_element_type=jnp.float32) + b2_ref[...]
    g_ref[...] = jnp.clip(s + 3.0, 0.0, 6.0) * (1.0 / 6.0)     # HSigmoid


def se_gates(means, w1, b1, w2, b2):
    """means: (NT, C) f32 -> gates (NT, C) f32 (one batched FC->ReLU->FC->HSig)."""
    NT, C = means.shape
    Cr = w1.shape[-1]
    NTp = ((NT + 7) // 8) * 8
    m = jnp.pad(means, ((0, NTp - NT), (0, 0))) if NTp != NT else means
    specs = [pl.BlockSpec(memory_space=pltpu.MemorySpace.VMEM) for _ in range(5)]
    g = pl.pallas_call(
        _se_gates_kernel,
        out_shape=jax.ShapeDtypeStruct((NTp, C), jnp.float32),
        in_specs=specs,
        out_specs=pl.BlockSpec(memory_space=pltpu.MemorySpace.VMEM),
    )(m, w1, b1.reshape(1, Cr), w2, b2.reshape(1, C))
    return g[:NT]


# ---------------- kernel 6: apply per-frame SE gate (head epilogue) -----------
def _scale_kernel(x_ref, g_ref, o_ref):
    o_ref[0] = (x_ref[0].astype(jnp.float32) * g_ref[0]).astype(o_ref.dtype)


def scale_frames(x, gates, out_dtype=jnp.float32):
    NT, HW, C = x.shape
    return pl.pallas_call(
        _scale_kernel,
        out_shape=jax.ShapeDtypeStruct((NT, HW, C), out_dtype),
        grid=(NT,),
        in_specs=[pl.BlockSpec((1, HW, C), lambda i: (i, 0, 0)),
                  pl.BlockSpec((1, 1, C), lambda i: (i, 0, 0))],
        out_specs=pl.BlockSpec((1, HW, C), lambda i: (i, 0, 0)),
        compiler_params=pltpu.CompilerParams(dimension_semantics=("parallel",)),
    )(x, gates)


# ------------------------- deterministic parameter setup ----------------------
class _KeyGen:
    def __init__(self, seed):
        self._key = jax.random.PRNGKey(seed)

    def __call__(self):
        self._key, k = jax.random.split(self._key)
        return k


def _he(kg, shape, fan_in):
    return jax.random.normal(kg(), shape, jnp.float32) * jnp.sqrt(2.0 / fan_in)


def _bn(kg, c):
    gamma = 1.0 + 0.1 * jax.random.normal(kg(), (c,), jnp.float32)
    beta = 0.05 * jax.random.normal(kg(), (c,), jnp.float32)
    mean = 0.05 * jax.random.normal(kg(), (c,), jnp.float32)
    var = 0.9 + 0.2 * jax.random.uniform(kg(), (c,), jnp.float32)
    return gamma, beta, mean, var


def _fold_bn(w, bn, eps=1e-5):
    """Fold eval-mode BatchNorm3d into a conv whose weight has Cout last."""
    gamma, beta, mean, var = bn
    scale = gamma / jnp.sqrt(var + eps)
    return w * scale, beta - mean * scale


def _se_params(kg, c, reduction=4):
    cr = c // reduction
    return dict(
        se_w1=_he(kg, (c, cr), c).astype(jnp.bfloat16),
        se_b1=0.01 * jax.random.normal(kg(), (cr,), jnp.float32),
        se_w2=_he(kg, (cr, c), cr).astype(jnp.bfloat16),
        se_b2=0.01 * jax.random.normal(kg(), (c,), jnp.float32),
    )


def build_params(seed=0, mode="small", num_input_layers=3, width_mult=1.0,
                 temporal_kernels=3, pool1_stride_t=2):
    assert pool1_stride_t == 2   # default; stem kernel fuses the (2,1,1) AvgPool
    cfg = ARCH_SETTINGS[mode]
    kg = _KeyGen(seed)
    params = dict(mode=mode, pool1_stride_t=pool1_stride_t)

    # stem: conv_1xkxk_bn(3, 16, k=3, stride=2) + AvgPool3d(t) + HSwish
    c0 = make_divisible(16 * width_mult, 8)
    w = _he(kg, (3, 3, num_input_layers, c0), num_input_layers * 9)
    w, b = _fold_bn(w, _bn(kg, c0))
    params["stem"] = dict(w=w.reshape(9 * num_input_layers, c0).astype(jnp.bfloat16),
                          b=b, cout=c0)

    blocks = []
    in_ch = c0
    exp = c0
    for (k, exp, c, se, hs, s) in cfg:
        out_ch = make_divisible(c * width_mult, 8)
        kt = temporal_kernels
        p = dict(k=k, hidden=exp, out=out_ch, use_se=bool(se), use_hs=bool(hs),
                 s=s, kt=kt, in_eq_hidden=(in_ch == exp),
                 identity=(s == 1 and in_ch == out_ch))        # temporal stride == 1
        if not p["in_eq_hidden"]:
            we = _he(kg, (in_ch, exp), in_ch)
            we, be = _fold_bn(we, _bn(kg, exp))
            p["w_exp"], p["b_exp"] = we.astype(jnp.bfloat16), be
        wd = _he(kg, (k, k, exp), k * k)
        p["w_dw"], p["b_dw"] = _fold_bn(wd, _bn(kg, exp))       # keep f32 (VPU path)
        if p["use_se"]:
            p.update(_se_params(kg, exp))
        wp = _he(kg, (kt, exp, out_ch), kt * exp)
        wp, bp = _fold_bn(wp, _bn(kg, out_ch))
        p["w_proj"], p["b_proj"] = wp.astype(jnp.bfloat16), bp
        blocks.append(p)
        in_ch = out_ch
    params["blocks"] = blocks

    # out conv: conv_1x1x1_bn(in, 576) + HSwish + SELayer_3D (mode == 'small')
    head_c = make_divisible(exp * width_mult, 8)
    wh = _he(kg, (1, in_ch, head_c), in_ch)
    wh, bh = _fold_bn(wh, _bn(kg, head_c))
    head = dict(cout=head_c, w=wh.astype(jnp.bfloat16), b=bh)
    if mode == "small":
        head.update(_se_params(kg, head_c))
    params["head"] = head
    return params


# --------------------------------- forward -----------------------------------
def _block_forward(y, shape, p):
    N, T, H, W, Cin = shape
    NT = N * T
    act = "hswish" if p["use_hs"] else "relu"
    ch = p["hidden"]
    s = p["s"]

    if p["in_eq_hidden"]:
        # [dw 1xkxk + BN, act, SE?] -> projection
        dw_in = y.reshape(NT, H, W, Cin)
        dw_act = act
        proj_in_act = "none"
    else:
        # [1x1x1 + BN, act, dw 1xkxk + BN, SE?, act] -> projection
        z1 = pointwise_gemm(y.reshape(NT * H * W, Cin), p["w_exp"], p["b_exp"], act=act)
        dw_in = z1.reshape(NT, H, W, ch)
        dw_act = "none" if p["use_se"] else act
        proj_in_act = act if p["use_se"] else "none"

    dw_res = depthwise_conv2d(dw_in, p["w_dw"], p["b_dw"], stride=s, act=dw_act,
                              with_mean=p["use_se"])
    if p["use_se"]:
        z, means = dw_res
        gates = se_gates(means.reshape(NT, ch), p["se_w1"], p["se_b1"],
                         p["se_w2"], p["se_b2"]).reshape(NT, 1, ch)
    else:
        z = dw_res
        gates = None
        proj_in_act = "none"
    Ho, Wo = z.shape[1], z.shape[2]

    # projection: conv_kx1x1_bn(hidden, out), temporal stride 1 (+ fused residual)
    skip = y if p["identity"] else None
    out = frame_conv(z.reshape(NT, Ho * Wo, ch), p["w_proj"], p["b_proj"], T=T,
                     act_in=proj_in_act, act_out="none", gates=gates, skip=skip)
    return out, (N, T, Ho, Wo, p["out"])


def _head_forward(y, shape, p, mode):
    N, T, H, W, Cin = shape
    NT = N * T
    C = p["cout"]
    if mode == "small":
        z, means = frame_conv(y, p["w"], p["b"], T=T, act_out="hswish", with_mean=True)
        gates = se_gates(means.reshape(NT, C), p["se_w1"], p["se_b1"],
                         p["se_w2"], p["se_b2"]).reshape(NT, 1, C)
        z = scale_frames(z, gates, out_dtype=jnp.float32)
    else:
        z = frame_conv(y, p["w"], p["b"], T=T, act_out="hswish", out_dtype=jnp.float32)
    return z, (N, T, H, W, C)


def mobilenetv3_s3d_forward(x_ncthw, params):
    """MobileNetV3_S3D.forward (eval mode, default flags). Returns a list of outs."""
    # TODO(synk): training-only paths (gumbel_sigmoid, Dropout, losses) and the
    # ResidualAttention modules (disabled with default use_st_att=0) are not built.
    x = jnp.transpose(x_ncthw, (0, 2, 3, 4, 1)).astype(jnp.float32)   # NCTHW -> NTHWC
    y, shape = _stem_forward(x, params["stem"])
    for p in params["blocks"]:
        y, shape = _block_forward(y, shape, p)
    # out_ids == [len(features) - 1]; out_conv consumes that single output
    y, shape = _head_forward(y, shape, params["head"], params["mode"])
    N, T, H, W, C = shape
    out = jnp.transpose(y.reshape(N, T, H, W, C), (0, 4, 1, 2, 3))    # back to NCTHW
    return [out]


if __name__ == "__main__":
    params = build_params(seed=0)
    x = jax.random.normal(jax.random.PRNGKey(0), (2, 3, 8, 32, 32), jnp.float32)
    outs = mobilenetv3_s3d_forward(x, params)
    out = jax.block_until_ready(outs[0])
    assert out.shape == (2, 576, 4, 1, 1), out.shape
    assert bool(jnp.all(jnp.isfinite(out)))
    print("KERNEL_OK")
</pallas_src>

<mosaic_0001>
module attributes {stable_mosaic.version = 11 : i64} {
  func.func @_stem_kernel(%arg0: i32, %arg1: memref<1x2x256x27xbf16, #tpu.memory_space<vmem>>, %arg2: memref<27x16xbf16, #tpu.memory_space<vmem>>, %arg3: memref<1x16xf32, #tpu.memory_space<vmem>>, %arg4: memref<1x256x16xbf16, #tpu.memory_space<vmem>>) attributes {dimension_semantics = [#tpu.dimension_semantics<parallel>], iteration_bounds = array<i64: 8>, scalar_prefetch = 0 : i64, scratch_operands = 0 : i64, tpu.core_type = #tpu.core_type<tc>, window_params = [{transform_indices = @transform_0, window_bounds = array<i64: 1, 2, 256, 27>}, {pipeline_mode = #tpu.pipeline_mode<synchronous>, transform_indices = @transform_1, window_bounds = array<i64: 27, 16>}, {pipeline_mode = #tpu.pipeline_mode<synchronous>, transform_indices = @transform_2, window_bounds = array<i64: 1, 16>}, {transform_indices = @transform_3, window_bounds = array<i64: 1, 256, 16>}]} {
    %c0 = arith.constant 0 : index
    %c0_0 = arith.constant 0 : index
    %0 = vector.load %arg2[%c0, %c0_0] : memref<27x16xbf16, #tpu.memory_space<vmem>>, vector<27x16xbf16>
    %c0_1 = arith.constant 0 : index
    %c0_2 = arith.constant 0 : index
    %c0_3 = arith.constant 0 : index
    %c0_4 = arith.constant 0 : index
    %1 = vector.load %arg1[%c0_1, %c0_2, %c0_3, %c0_4] : memref<1x2x256x27xbf16, #tpu.memory_space<vmem>>, vector<1x1x256x27xbf16>
    %2 = vector.shape_cast %1 : vector<1x1x256x27xbf16> to vector<256x27xbf16>
    %cst = arith.constant dense<0.000000e+00> : vector<256x16xf32>
    %3 = tpu.matmul %2, %0, %cst {dimension_numbers = #tpu.dot_dimension_numbers<[1], [0], [0], [1], [0, 0, 1, 1], [], []>} : vector<256x27xbf16>, vector<27x16xbf16>, vector<256x16xf32> -> vector<256x16xf32>
    %c0_5 = arith.constant 0 : index
    %c1 = arith.constant 1 : index
    %c0_6 = arith.constant 0 : index
    %c0_7 = arith.constant 0 : index
    %4 = vector.load %arg1[%c0_5, %c1, %c0_6, %c0_7] : memref<1x2x256x27xbf16, #tpu.memory_space<vmem>>, vector<1x1x256x27xbf16>
    %5 = vector.shape_cast %4 : vector<1x1x256x27xbf16> to vector<256x27xbf16>
    %cst_8 = arith.constant dense<0.000000e+00> : vector<256x16xf32>
    %6 = tpu.matmul %5, %0, %cst_8 {dimension_numbers = #tpu.dot_dimension_numbers<[1], [0], [0], [1], [0, 0, 1, 1], [], []>} : vector<256x27xbf16>, vector<27x16xbf16>, vector<256x16xf32> -> vector<256x16xf32>
    %7 = arith.addf %3, %6 : vector<256x16xf32>
    %cst_9 = arith.constant 5.000000e-01 : f32
    %8 = vector.broadcast %cst_9 : f32 to vector<256x16xf32>
    %9 = arith.mulf %8, %7 : vector<256x16xf32>
    %c0_10 = arith.constant 0 : index
    %c0_11 = arith.constant 0 : index
    %10 = vector.load %arg3[%c0_10, %c0_11] : memref<1x16xf32, #tpu.memory_space<vmem>>, vector<1x16xf32>
    %11 = vector.broadcast %10 : vector<1x16xf32> to vector<256x16xf32>
    %12 = arith.addf %9, %11 : vector<256x16xf32>
    %cst_12 = arith.constant 3.000000e+00 : f32
    %13 = vector.broadcast %cst_12 : f32 to vector<256x16xf32>
    %14 = arith.addf %12, %13 : vector<256x16xf32>
    %cst_13 = arith.constant 0.000000e+00 : f32
    %cst_14 = arith.constant 6.000000e+00 : f32
    %15 = vector.broadcast %cst_13 : f32 to vector<256x16xf32>
    %16 = arith.maximumf %15, %14 : vector<256x16xf32>
    %17 = vector.broadcast %cst_14 : f32 to vector<256x16xf32>
    %18 = arith.minimumf %17, %16 : vector<256x16xf32>
    %cst_15 = arith.constant 0.166666672 : f32
    %19 = vector.broadcast %cst_15 : f32 to vector<256x16xf32>
    %20 = arith.mulf %18, %19 : vector<256x16xf32>
    %21 = arith.mulf %12, %20 : vector<256x16xf32>
    %22 = arith.truncf %21 : vector<256x16xf32> to vector<256x16xbf16>
    %c0_16 = arith.constant 0 : index
    %c0_17 = arith.constant 0 : index
    %c0_18 = arith.constant 0 : index
    %23 = vector.load %arg4[%c0_16, %c0_17, %c0_18] : memref<1x256x16xbf16, #tpu.memory_space<vmem>>, vector<1x256x16xbf16>
    %24 = vector.shape_cast %23 : vector<1x256x16xbf16> to vector<256x16xbf16>
    %25 = vector.shape_cast %22 : vector<256x16xbf16> to vector<1x256x16xbf16>
    tpu.vector_store %arg4[%c0_16, %c0_17, %c0_18], %25 {strides = array<i32>} : memref<1x256x16xbf16, #tpu.memory_space<vmem>>, vector<1x256x16xbf16>,
    return
  }
  func.func @transform_0(%arg0: i32) -> (i32, i32, i32, i32) {
    %c0_i32 = arith.constant 0 : i32
    %c0_i32_0 = arith.constant 0 : i32
    %c0_i32_1 = arith.constant 0 : i32
    %c0_i32_2 = arith.constant 0 : i32
    return %arg0, %c0_i32, %c0_i32_0, %c0_i32_1 : i32, i32, i32, i32
  }
  func.func @transform_1(%arg0: i32) -> (i32, i32) {
    %c0_i32 = arith.constant 0 : i32
    %c0_i32_0 = arith.constant 0 : i32
    %c0_i32_1 = arith.constant 0 : i32
    return %c0_i32, %c0_i32_0 : i32, i32
  }
  func.func @transform_2(%arg0: i32) -> (i32, i32) {
    %c0_i32 = arith.constant 0 : i32
    %c0_i32_0 = arith.constant 0 : i32
    %c0_i32_1 = arith.constant 0 : i32
    return %c0_i32, %c0_i32_0 : i32, i32
  }
  func.func @transform_3(%arg0: i32) -> (i32, i32, i32) {
    %c0_i32 = arith.constant 0 : i32
    %c0_i32_0 = arith.constant 0 : i32
    %c0_i32_1 = arith.constant 0 : i32
    return %arg0, %c0_i32, %c0_i32_0 : i32, i32, i32
  }
}

</mosaic_0001>

<bundles_post_ra>
// kernel: tpu_custom_call.1
= control target key start
LH: loop header
LB: loop body
LE: loop exit
PB: predicated region body
PF: predicated region fallthrough
CT: control target
= control target key end

     0   :  { %s1673_s12 = smov 0   ;;  %s1869_s0 = inlined_call_operand.vmem [shape: bf16[8,2,256,27], index: 0, kind: input, shape index: {}]   ;;  %s1870_s1 = inlined_call_operand.vmem [shape: bf16[27,16], index: 1, kind: input, shape index: {}]   ;;  %s1871_s2 = inlined_call_operand.vmem [shape: f32[1,16], index: 2, kind: input, shape index: {}]   ;;  %s1872_s3 = inlined_call_operand.vmem [shape: bf16[8,256,16], index: 3, kind: output, shape index: {}]  }
   0x1 LB: > { %s1285_s13 = sadd.s32 4294967295, %s1650_s12   ;;  %p1289_p0 = scmp.ge.s32.totalorder %s1650_s12, 1  ;;  %s1650_s12 = sphi %s1673_s12, %s13_s12  }
   0x2   : > { %p137_p1 = scmp.lt.s32.totalorder %s1650_s12, 9 }
   0x4   : > { %p138_p2 = pnand %p1289_p0, %p137_p1 }
   0x5   : > { %v1610_v0 = vld [vmem:[%s1870_s1] sm:$0xff] (!%p138_p2)   ;;  %vm381_vm0 = vcmask (!%p138_p2), 1044480   ;;  %v1611_v1 = vld [vmem:[%s1870_s1 + $0x8] sm:$0x3f] (!%p138_p2)   ;;  %vm382_vm1 = vcmask (!%p138_p2), 1045504   ;;  %p161_p3 = scmp.lt.s32.totalorder (!%p138_p2), %s1285_s13, 7 }
   0x6   : > { %141 = sbr.rel (%p138_p2) target bundleno = 316 (0x13c), region = 32  ;;  %1497 = vmatprep.subr.bf16.mxu1 (!%p138_p2), %v1610_v0  ;;  %1533 = vmatprep.subr.bf16.mxu0 (!%p138_p2), %v1610_v0  ;;  %v1652_v2 = vmov (!%p138_p2), 65535   ;;  %vm332_vm2 = vcmask (!%p138_p2), 220160   ;;  %v1762_v44 = vld [vmem:[%s1871_s2] ss:$0 sm:$0xff] (!%p138_p2)  ;;  %vm1197_vm3 = vcmask (!%p138_p2), 125952  }
   0x7   : > { %1498 = vmatpush3.bf16.msra.mxu1 (!%p138_p2), %v1610_v0  ;;  %1534 = vmatpush3.bf16.msra.mxu0 (!%p138_p2), %v1610_v0  ;;  %v383_v3 = vsel (!%p138_p2), %vm381_vm0, 4294967295, %v1652_v2 }
   0x8   : > { %v384_v4 = vsel (!%p138_p2), %vm382_vm1, %v383_v3, 0 }
   0x9   : > { %v386_v5 = vand.u32 (!%p138_p2), %v1611_v1, %v384_v4 }
   0xb   : > { %1499 = vmatprep.subr.bf16.mxu1 (!%p138_p2), %v386_v5  ;;  %1535 = vmatprep.subr.bf16.mxu0 (!%p138_p2), %v386_v5 }
   0xc   : > { %1500 = vmatpush3.bf16.msra.mxu1 (!%p138_p2), %v386_v5  ;;  %1536 = vmatpush3.bf16.msra.mxu0 (!%p138_p2), %v386_v5 }
   0xd   : > { %s1874_s13 = smov (!%p161_p3, %s1285_s13), 7 }
   0xe   : > { %s1427_s18 = sshll.u32 %s1874_s13, 8  ;;  %s1428_s24 = sshll.u32 %s1874_s13, 7 }
   0xf   : > { %s1693_s21 = scalar_lea.vmem %s1869_s0, %s1427_s18  ;;  %s1775_s27 = scalar_lea.vmem %s1872_s3, %s1428_s24 }
  0x10   : > { %v1612_v6 = vld [vmem:[%s1693_s21 + $0x80] sm:$0xff]   ;;  %v1614_v8 = vld [vmem:[%s1693_s21 + $0x88] sm:$0xff]   ;;  %v1616_v10 = vld [vmem:[%s1693_s21 + $0x90] sm:$0xff]  }
  0x11   : > { %v1613_v7 = vld [vmem:[%s1693_s21] sm:$0xff]   ;;  %1501 = vmatprep.mubr.msk.bf16.mxu1 %vm332_vm2, %v1612_v6  ;;  %v1615_v9 = vld [vmem:[%s1693_s21 + $0x8] sm:$0xff]   ;;  %v1617_v11 = vld [vmem:[%s1693_s21 + $0x10] sm:$0xff]  }
  0x12   : > { %1537 = vmatprep.mubr.msk.bf16.mxu0 %vm332_vm2, %v1613_v7  ;;  %1502 = vmatmul.mubr.msk.bf16.vlgmr.msra.gmra.mrb[0].mxu1 %vm332_vm2, %v1614_v8  ;;  %v1618_v12 = vld [vmem:[%s1693_s21 + $0x98] sm:$0xff]   ;;  %v1620_v14 = vld [vmem:[%s1693_s21 + $0xa0] sm:$0xff]   ;;  %v1622_v16 = vld [vmem:[%s1693_s21 + $0xa8] sm:$0xff]  }
  0x13   : > { %1538 = vmatmul.mubr.msk.bf16.vlgmr.msra.gmra.mrb[0].mxu0 %vm332_vm2, %v1615_v9  ;;  %1505 = vmatprep.mubr.msk.bf16.mxu1 %vm332_vm2, %v1616_v10  ;;  %v1619_v13 = vld [vmem:[%s1693_s21 + $0x18] sm:$0xff]   ;;  %v1621_v15 = vld [vmem:[%s1693_s21 + $0x20] sm:$0xff]   ;;  %v1623_v17 = vld [vmem:[%s1693_s21 + $0x28] sm:$0xff]  }
  0x14   : > { %1541 = vmatprep.mubr.msk.bf16.mxu0 %vm332_vm2, %v1617_v11  ;;  %v1624_v18 = vld [vmem:[%s1693_s21 + $0xb0] sm:$0xff]   ;;  %v1626_v20 = vld [vmem:[%s1693_s21 + $0xb8] sm:$0xff]   ;;  %v1628_v22 = vld [vmem:[%s1693_s21 + $0xc0] sm:$0xff]  }
  0x15   : > { %v1625_v19 = vld [vmem:[%s1693_s21 + $0x30] sm:$0xff]   ;;  %v1627_v21 = vld [vmem:[%s1693_s21 + $0x38] sm:$0xff]   ;;  %v1629_v23 = vld [vmem:[%s1693_s21 + $0x40] sm:$0xff]  }
  0x16   : > { %v1630_v24 = vld [vmem:[%s1693_s21 + $0xc8] sm:$0xff]   ;;  %v1632_v26 = vld [vmem:[%s1693_s21 + $0xd0] sm:$0xff]   ;;  %v1634_v28 = vld [vmem:[%s1693_s21 + $0xd8] sm:$0xff]  }
  0x17   : > { %v1631_v25 = vld [vmem:[%s1693_s21 + $0x48] sm:$0xff]   ;;  %v1633_v27 = vld [vmem:[%s1693_s21 + $0x50] sm:$0xff]   ;;  %v1635_v29 = vld [vmem:[%s1693_s21 + $0x58] sm:$0xff]  }
  0x18   : > { %v1636_v30 = vld [vmem:[%s1693_s21 + $0xe0] sm:$0xff]   ;;  %v1638_v32 = vld [vmem:[%s1693_s21 + $0xe8] sm:$0xff]   ;;  %v1640_v34 = vld [vmem:[%s1693_s21 + $0xf0] sm:$0xff]  }
  0x19   : > { %v1637_v31 = vld [vmem:[%s1693_s21 + $0x60] sm:$0xff]   ;;  %v1639_v33 = vld [vmem:[%s1693_s21 + $0x68] sm:$0xff]   ;;  %v1641_v35 = vld [vmem:[%s1693_s21 + $0x70] sm:$0xff]  }
  0x1a   : > { %1506 = vmatmul.mubr.msk.bf16.gmra.mrb[4].mxu1 %vm332_vm2, %v1618_v12  ;;  %v1642_v36 = vld [vmem:[%s1693_s21 + $0xf8] sm:$0xff]  }
  0x1b   : > { %1542 = vmatmul.mubr.msk.bf16.gmra.mrb[4].mxu0 %vm332_vm2, %v1619_v13  ;;  %1509 = vmatprep.mubr.msk.bf16.mxu1 %vm332_vm2, %v1620_v14  ;;  %v1643_v37 = vld [vmem:[%s1693_s21 + $0x78] sm:$0xff]  }
  0x1c   : > { %1545 = vmatprep.mubr.msk.bf16.mxu0 %vm332_vm2, %v1621_v15 }
  0x22   : > { %1510 = vmatmul.mubr.msk.bf16.gmra.mrb[8].mxu1 %vm332_vm2, %v1622_v16 }
  0x23   : > { %1546 = vmatmul.mubr.msk.bf16.gmra.mrb[8].mxu0 %vm332_vm2, %v1623_v17  ;;  %1513 = vmatprep.mubr.msk.bf16.mxu1 %vm332_vm2, %v1624_v18 }
  0x24   : > { %1549 = vmatprep.mubr.msk.bf16.mxu0 %vm332_vm2, %v1625_v19 }
  0x2a   : > { %1514 = vmatmul.mubr.msk.bf16.gmra.mrb[12].mxu1 %vm332_vm2, %v1626_v20 }
  0x2b   : > { %1550 = vmatmul.mubr.msk.bf16.gmra.mrb[12].mxu0 %vm332_vm2, %v1627_v21  ;;  %1517 = vmatprep.mubr.msk.bf16.mxu1 %vm332_vm2, %v1628_v22 }
  0x2c   : > { %1553 = vmatprep.mubr.msk.bf16.mxu0 %vm332_vm2, %v1629_v23 }
  0x32   : > { %1518 = vmatmul.mubr.msk.bf16.gmra.mrb[16].mxu1 %vm332_vm2, %v1630_v24 }
  0x33   : > { %1554 = vmatmul.mubr.msk.bf16.gmra.mrb[16].mxu0 %vm332_vm2, %v1631_v25  ;;  %1521 = vmatprep.mubr.msk.bf16.mxu1 %vm332_vm2, %v1632_v26 }
  0x34   : > { %1557 = vmatprep.mubr.msk.bf16.mxu0 %vm332_vm2, %v1633_v27 }
  0x3a   : > { %1522 = vmatmul.mubr.msk.bf16.gmra.mrb[20].mxu1 %vm332_vm2, %v1634_v28 }
  0x3b   : > { %1558 = vmatmul.mubr.msk.bf16.gmra.mrb[20].mxu0 %vm332_vm2, %v1635_v29  ;;  %1525 = vmatprep.mubr.msk.bf16.mxu1 %vm332_vm2, %v1636_v30 }
  0x3c   : > { %1561 = vmatprep.mubr.msk.bf16.mxu0 %vm332_vm2, %v1637_v31 }
  0x42   : > { %1526 = vmatmul.mubr.msk.bf16.gmra.mrb[24].mxu1 %vm332_vm2, %v1638_v32 }
  0x43   : > { %1562 = vmatmul.mubr.msk.bf16.gmra.mrb[24].mxu0 %vm332_vm2, %v1639_v33  ;;  %1529 = vmatprep.mubr.msk.bf16.mxu1 %vm332_vm2, %v1640_v34 }
  0x44   : > { %1565 = vmatprep.mubr.msk.bf16.mxu0 %vm332_vm2, %v1641_v35 }
  0x4a   : > { %1530 = vmatmul.mubr.msk.bf16.gmra.mrb[28].mxu1 %vm332_vm2, %v1642_v36 }
  0x4b   : > { %1566 = vmatmul.mubr.msk.bf16.gmra.mrb[28].mxu0 %vm332_vm2, %v1643_v37 }
  0xe5   : > { %v1503_v38 = vpop.f32.mrb[0].mxu1 }
  0xe6   : > { %v1539_v39 = vpop.f32.mrb[0].mxu0  ;;  %v422_v40 = vpop.f32.mrb[1].mxu1 }
  0xe7   : > { %v720_v41 = vadd.f32 %v1539_v39, %v1503_v38  ;;  %v711_v42 = vpop.f32.mrb[1].mxu0  ;;  %v1504_v43 = vpop.f32.mrb[2].mxu1 }
  0xe8   : > { %v712_v45 = vadd.f32 %v711_v42, %v422_v40  ;;  %v1540_v46 = vpop.f32.mrb[2].mxu0  ;;  %v425_v47 = vpop.f32.mrb[3].mxu1 }
  0xe9   : > { %v840_v48 = vmul.f32 0.5, %v720_v41  ;;  %v723_v49 = vadd.f32 %v1540_v46, %v1504_v43  ;;  %v714_v50 = vpop.f32.mrb[3].mxu0 }
  0xea   : > { %v838_v51 = vmul.f32 0.5, %v712_v45  ;;  %v715_v52 = vadd.f32 %v714_v50, %v425_v47 }
  0xeb   : > { %v879_v53 = vadd.f32 %v1762_v44, %v840_v48  ;;  %v841_v54 = vmul.f32 0.5, %v723_v49 }
  0xec   : > { %v877_v55 = vadd.f32 %v1762_v44, %v838_v51  ;;  %v839_v56 = vmul.f32 0.5, %v715_v52 }
  0xed   : > { %v911_v57 = vadd.f32 3.0, %v879_v53  ;;  %v880_v58 = vadd.f32 %v1762_v44, %v841_v54  ;;  %v1507_v59 = vpop.f32.mrb[4].mxu1 }
  0xee   : > { %v909_v60 = vadd.f32 3.0, %v877_v55  ;;  %v878_v61 = vadd.f32 %v1762_v44, %v839_v56  ;;  %v1543_v62 = vpop.f32.mrb[4].mxu0  ;;  %v438_v63 = vpop.f32.mrb[5].mxu1 }
  0xef   : > { %v943_v0 = vmax.f32 %v911_v57, 0.0  ;;  %v912_v1 = vadd.f32 3.0, %v880_v58  ;;  %v736_v2 = vadd.f32 %v1543_v62, %v1507_v59  ;;  %v727_v3 = vpop.f32.mrb[5].mxu0  ;;  %v1508_v4 = vpop.f32.mrb[6].mxu1 }
  0xf0   : > { %v941_v5 = vmax.f32 %v909_v60, 0.0  ;;  %v910_v6 = vadd.f32 3.0, %v878_v61  ;;  %v728_v7 = vadd.f32 %v727_v3, %v438_v63  ;;  %v1544_v8 = vpop.f32.mrb[6].mxu0  ;;  %v441_v9 = vpop.f32.mrb[7].mxu1 }
  0xf1   : > { %v975_v10 = vmin.f32 %v943_v0, 6.0  ;;  %v944_v11 = vmax.f32 %v912_v1, 0.0  ;;  %v844_v12 = vmul.f32 0.5, %v736_v2  ;;  %v739_v13 = vadd.f32 %v1544_v8, %v1508_v4  ;;  %v730_v14 = vpop.f32.mrb[7].mxu0 }
  0xf2   : > { %v973_v15 = vmin.f32 %v941_v5, 6.0  ;;  %v942_v16 = vmax.f32 %v910_v6, 0.0  ;;  %v842_v17 = vmul.f32 0.5, %v728_v7  ;;  %v731_v18 = vadd.f32 %v730_v14, %v441_v9 }
  0xf3   : > { %v1007_v19 = vmul.f32 0.16666667, %v975_v10  ;;  %v976_v20 = vmin.f32 %v944_v11, 6.0  ;;  %v883_v21 = vadd.f32 %v1762_v44, %v844_v12  ;;  %v845_v22 = vmul.f32 0.5, %v739_v13 }
  0xf4   : > { %v1005_v23 = vmul.f32 0.16666667, %v973_v15  ;;  %v974_v24 = vmin.f32 %v942_v16, 6.0  ;;  %v881_v25 = vadd.f32 %v1762_v44, %v842_v17  ;;  %v843_v26 = vmul.f32 0.5, %v731_v18 }
  0xf5   : > { %v1039_v27 = vmul.f32 %v1007_v19, %v879_v53  ;;  %v1008_v28 = vmul.f32 0.16666667, %v976_v20  ;;  %v915_v29 = vadd.f32 3.0, %v883_v21  ;;  %v884_v30 = vadd.f32 %v1762_v44, %v845_v22  ;;  %v1511_v31 = vpop.f32.mrb[8].mxu1 }
  0xf6   : > { %v1037_v32 = vmul.f32 %v1005_v23, %v877_v55  ;;  %v1006_v33 = vmul.f32 0.16666667, %v974_v24  ;;  %v913_v34 = vadd.f32 3.0, %v881_v25  ;;  %v882_v35 = vadd.f32 %v1762_v44, %v843_v26  ;;  %v1547_v36 = vpop.f32.mrb[8].mxu0  ;;  %v454_v37 = vpop.f32.mrb[9].mxu1 }
  0xf7   : > { %v1431_v38 = vpack.c.bf16 %v1039_v27, %v1039_v27  ;;  %v1040_v39 = vmul.f32 %v1008_v28, %v880_v58  ;;  %v947_v40 = vmax.f32 %v915_v29, 0.0  ;;  %v916_v41 = vadd.f32 3.0, %v884_v30  ;;  %v743_v42 = vpop.f32.mrb[9].mxu0  ;;  %v1512_v43 = vpop.f32.mrb[10].mxu1 }
  0xf8   : > { %v1429_v45 = vpack.c.bf16 %v1037_v32, %v1037_v32  ;;  %v1038_v46 = vmul.f32 %v1006_v33, %v878_v61  ;;  %v945_v47 = vmax.f32 %v913_v34, 0.0  ;;  %v914_v48 = vadd.f32 3.0, %v882_v35  ;;  %v1548_v49 = vpop.f32.mrb[10].mxu0  ;;  %v457_v50 = vpop.f32.mrb[11].mxu1 }
  0xf9   : > { %1200 = vst.msk [vmem:[%s1775_s27 + $0x8] sm:$0xf] %vm1197_vm3, %v1431_v38  ;;  %v1432_v51 = vpack.c.bf16 %v1040_v39, %v1040_v39  ;;  %v979_v52 = vmin.f32 %v947_v40, 6.0  ;;  %v948_v53 = vmax.f32 %v916_v41, 0.0  ;;  %v752_v54 = vadd.f32 %v1547_v36, %v1511_v31  ;;  %v746_v55 = vpop.f32.mrb[11].mxu0 }
  0xfa   : > { %1198 = vst.msk [vmem:[%s1775_s27] sm:$0xf] %vm1197_vm3, %v1429_v45  ;;  %v1430_v56 = vpack.c.bf16 %v1038_v46, %v1038_v46  ;;  %v977_v57 = vmin.f32 %v945_v47, 6.0  ;;  %v946_v58 = vmax.f32 %v914_v48, 0.0  ;;  %v744_v59 = vadd.f32 %v743_v42, %v454_v37 }
  0xfb   : > { %1201 = vst.msk [vmem:[%s1775_s27 + $0xc] sm:$0xf] %vm1197_vm3, %v1432_v51  ;;  %v1011_v60 = vmul.f32 0.16666667, %v979_v52  ;;  %v980_v61 = vmin.f32 %v948_v53, 6.0  ;;  %v848_v62 = vmul.f32 0.5, %v752_v54  ;;  %v755_v63 = vadd.f32 %v1548_v49, %v1512_v43 }
  0xfc   : > { %1199 = vst.msk [vmem:[%s1775_s27 + $0x4] sm:$0xf] %vm1197_vm3, %v1430_v56  ;;  %v1009_v0 = vmul.f32 0.16666667, %v977_v57  ;;  %v978_v1 = vmin.f32 %v946_v58, 6.0  ;;  %v846_v2 = vmul.f32 0.5, %v744_v59  ;;  %v747_v3 = vadd.f32 %v746_v55, %v457_v50 }
  0xfd   : > { %v1043_v4 = vmul.f32 %v1011_v60, %v883_v21  ;;  %v1012_v5 = vmul.f32 0.16666667, %v980_v61  ;;  %v887_v6 = vadd.f32 %v1762_v44, %v848_v62  ;;  %v849_v7 = vmul.f32 0.5, %v755_v63  ;;  %v1515_v8 = vpop.f32.mrb[12].mxu1 }
  0xfe   : > { %v1041_v9 = vmul.f32 %v1009_v0, %v881_v25  ;;  %v1010_v10 = vmul.f32 0.16666667, %v978_v1  ;;  %v885_v11 = vadd.f32 %v1762_v44, %v846_v2  ;;  %v847_v12 = vmul.f32 0.5, %v747_v3  ;;  %v1551_v13 = vpop.f32.mrb[12].mxu0  ;;  %v470_v14 = vpop.f32.mrb[13].mxu1 }
  0xff   : > { %v1435_v15 = vpack.c.bf16 %v1043_v4, %v1043_v4  ;;  %v1044_v16 = vmul.f32 %v1012_v5, %v884_v30  ;;  %v919_v17 = vadd.f32 3.0, %v887_v6  ;;  %v888_v18 = vadd.f32 %v1762_v44, %v849_v7  ;;  %v759_v19 = vpop.f32.mrb[13].mxu0  ;;  %v1516_v20 = vpop.f32.mrb[14].mxu1 }
 0x100   : > { %v1433_v21 = vpack.c.bf16 %v1041_v9, %v1041_v9  ;;  %v1042_v22 = vmul.f32 %v1010_v10, %v882_v35  ;;  %v917_v23 = vadd.f32 3.0, %v885_v11  ;;  %v886_v24 = vadd.f32 %v1762_v44, %v847_v12  ;;  %v1552_v25 = vpop.f32.mrb[14].mxu0  ;;  %v473_v26 = vpop.f32.mrb[15].mxu1 }
 0x101   : > { %1204 = vst.msk [vmem:[%s1775_s27 + $0x18] sm:$0xf] %vm1197_vm3, %v1435_v15  ;;  %v1436_v27 = vpack.c.bf16 %v1044_v16, %v1044_v16  ;;  %v951_v28 = vmax.f32 %v919_v17, 0.0  ;;  %v920_v29 = vadd.f32 3.0, %v888_v18  ;;  %v768_v30 = vadd.f32 %v1551_v13, %v1515_v8  ;;  %v762_v31 = vpop.f32.mrb[15].mxu0 }
 0x102   : > { %1202 = vst.msk [vmem:[%s1775_s27 + $0x10] sm:$0xf] %vm1197_vm3, %v1433_v21  ;;  %v1434_v32 = vpack.c.bf16 %v1042_v22, %v1042_v22  ;;  %v949_v33 = vmax.f32 %v917_v23, 0.0  ;;  %v918_v34 = vadd.f32 3.0, %v886_v24  ;;  %v760_v35 = vadd.f32 %v759_v19, %v470_v14 }
 0x103   : > { %1205 = vst.msk [vmem:[%s1775_s27 + $0x1c] sm:$0xf] %vm1197_vm3, %v1436_v27  ;;  %v983_v36 = vmin.f32 %v951_v28, 6.0  ;;  %v952_v37 = vmax.f32 %v920_v29, 0.0  ;;  %v852_v38 = vmul.f32 0.5, %v768_v30  ;;  %v771_v39 = vadd.f32 %v1552_v25, %v1516_v20 }
 0x104   : > { %1203 = vst.msk [vmem:[%s1775_s27 + $0x14] sm:$0xf] %vm1197_vm3, %v1434_v32  ;;  %v981_v40 = vmin.f32 %v949_v33, 6.0  ;;  %v950_v41 = vmax.f32 %v918_v34, 0.0  ;;  %v850_v42 = vmul.f32 0.5, %v760_v35  ;;  %v763_v43 = vadd.f32 %v762_v31, %v473_v26 }
 0x105   : > { %v1015_v45 = vmul.f32 0.16666667, %v983_v36  ;;  %v984_v46 = vmin.f32 %v952_v37, 6.0  ;;  %v891_v47 = vadd.f32 %v1762_v44, %v852_v38  ;;  %v853_v48 = vmul.f32 0.5, %v771_v39  ;;  %v1519_v49 = vpop.f32.mrb[16].mxu1 }
 0x106   : > { %v1013_v50 = vmul.f32 0.16666667, %v981_v40  ;;  %v982_v51 = vmin.f32 %v950_v41, 6.0  ;;  %v889_v52 = vadd.f32 %v1762_v44, %v850_v42  ;;  %v851_v53 = vmul.f32 0.5, %v763_v43  ;;  %v1555_v54 = vpop.f32.mrb[16].mxu0  ;;  %v486_v55 = vpop.f32.mrb[17].mxu1 }
 0x107   : > { %v1047_v56 = vmul.f32 %v1015_v45, %v887_v6  ;;  %v1016_v57 = vmul.f32 0.16666667, %v984_v46  ;;  %v923_v58 = vadd.f32 3.0, %v891_v47  ;;  %v892_v59 = vadd.f32 %v1762_v44, %v853_v48  ;;  %v775_v60 = vpop.f32.mrb[17].mxu0  ;;  %v1520_v61 = vpop.f32.mrb[18].mxu1 }
 0x108   : > { %v1045_v62 = vmul.f32 %v1013_v50, %v885_v11  ;;  %v1014_v63 = vmul.f32 0.16666667, %v982_v51  ;;  %v921_v0 = vadd.f32 3.0, %v889_v52  ;;  %v890_v1 = vadd.f32 %v1762_v44, %v851_v53  ;;  %v1556_v2 = vpop.f32.mrb[18].mxu0  ;;  %v489_v3 = vpop.f32.mrb[19].mxu1 }
 0x109   : > { %v1439_v4 = vpack.c.bf16 %v1047_v56, %v1047_v56  ;;  %v1048_v5 = vmul.f32 %v1016_v57, %v888_v18  ;;  %v955_v7 = vmax.f32 %v923_v58, 0.0  ;;  %v924_v8 = vadd.f32 3.0, %v892_v59  ;;  %v778_v6 = vpop.f32.mrb[19].mxu0 }
 0x10a   : > { %v1437_v9 = vpack.c.bf16 %v1045_v62, %v1045_v62  ;;  %v1046_v10 = vmul.f32 %v1014_v63, %v886_v24  ;;  %v953_v12 = vmax.f32 %v921_v0, 0.0  ;;  %v922_v13 = vadd.f32 3.0, %v890_v1 }
 0x10b   : > { %1208 = vst.msk [vmem:[%s1775_s27 + $0x28] sm:$0xf] %vm1197_vm3, %v1439_v4  ;;  %v1440_v11 = vpack.c.bf16 %v1048_v5, %v1048_v5  ;;  %v987_v14 = vmin.f32 %v955_v7, 6.0  ;;  %v956_v15 = vmax.f32 %v924_v8, 0.0  ;;  %v784_v16 = vadd.f32 %v1555_v54, %v1519_v49 }
 0x10c   : > { %1206 = vst.msk [vmem:[%s1775_s27 + $0x20] sm:$0xf] %vm1197_vm3, %v1437_v9  ;;  %v1438_v17 = vpack.c.bf16 %v1046_v10, %v1046_v10  ;;  %v985_v19 = vmin.f32 %v953_v12, 6.0  ;;  %v954_v18 = vmax.f32 %v922_v13, 0.0  ;;  %v776_v20 = vadd.f32 %v775_v60, %v486_v55 }
 0x10d   : > { %1209 = vst.msk [vmem:[%s1775_s27 + $0x2c] sm:$0xf] %vm1197_vm3, %v1440_v11  ;;  %v1019_v21 = vmul.f32 0.16666667, %v987_v14  ;;  %v988_v22 = vmin.f32 %v956_v15, 6.0  ;;  %v856_v23 = vmul.f32 0.5, %v784_v16  ;;  %v787_v24 = vadd.f32 %v1556_v2, %v1520_v61 }
 0x10e   : > { %v1523_v25 = vpop.f32.mrb[20].mxu1  ;;  %1207 = vst.msk [vmem:[%s1775_s27 + $0x24] sm:$0xf] %vm1197_vm3, %v1438_v17  ;;  %v1017_v26 = vmul.f32 0.16666667, %v985_v19  ;;  %v986_v27 = vmin.f32 %v954_v18, 6.0  ;;  %v779_v29 = vadd.f32 %v778_v6, %v489_v3 }
 0x10f   : > { %v854_v28 = vmul.f32 0.5, %v776_v20  ;;  %v1559_v30 = vpop.f32.mrb[20].mxu0  ;;  %v502_v31 = vpop.f32.mrb[21].mxu1  ;;  %v1051_v32 = vmul.f32 %v1019_v21, %v891_v47  ;;  %v1020_v33 = vmul.f32 0.16666667, %v988_v22  ;;  %v895_v34 = vadd.f32 %v1762_v44, %v856_v23 }
 0x110   : > { %v857_v35 = vmul.f32 0.5, %v787_v24  ;;  %v791_v36 = vpop.f32.mrb[21].mxu0  ;;  %v1524_v37 = vpop.f32.mrb[22].mxu1  ;;  %v1049_v38 = vmul.f32 %v1017_v26, %v889_v52  ;;  %v1018_v39 = vmul.f32 0.16666667, %v986_v27  ;;  %v855_v41 = vmul.f32 0.5, %v779_v29 }
 0x111   : > { %v893_v40 = vadd.f32 %v1762_v44, %v854_v28  ;;  %v1560_v42 = vpop.f32.mrb[22].mxu0  ;;  %v505_v43 = vpop.f32.mrb[23].mxu1  ;;  %v1443_v45 = vpack.c.bf16 %v1051_v32, %v1051_v32  ;;  %v1052_v46 = vmul.f32 %v1020_v33, %v892_v59  ;;  %v927_v48 = vadd.f32 3.0, %v895_v34 }
 0x112   : > { %v896_v47 = vadd.f32 %v1762_v44, %v857_v35  ;;  %v794_v49 = vpop.f32.mrb[23].mxu0  ;;  %v1441_v50 = vpack.c.bf16 %v1049_v38, %v1049_v38  ;;  %v1050_v51 = vmul.f32 %v1018_v39, %v890_v1  ;;  %v894_v54 = vadd.f32 %v1762_v44, %v855_v41 }
 0x113   : > { %v925_v53 = vadd.f32 3.0, %v893_v40  ;;  %1212 = vst.msk [vmem:[%s1775_s27 + $0x38] sm:$0xf] %vm1197_vm3, %v1443_v45  ;;  %v1444_v52 = vpack.c.bf16 %v1052_v46, %v1052_v46  ;;  %v959_v55 = vmax.f32 %v927_v48, 0.0  ;;  %v800_v57 = vadd.f32 %v1559_v30, %v1523_v25 }
 0x114   : > { %v928_v56 = vadd.f32 3.0, %v896_v47  ;;  %1210 = vst.msk [vmem:[%s1775_s27 + $0x30] sm:$0xf] %vm1197_vm3, %v1441_v50  ;;  %v1442_v58 = vpack.c.bf16 %v1050_v51, %v1050_v51  ;;  %v926_v60 = vadd.f32 3.0, %v894_v54  ;;  %v792_v61 = vadd.f32 %v791_v36, %v502_v31 }
 0x115   : > { %v957_v59 = vmax.f32 %v925_v53, 0.0  ;;  %1213 = vst.msk [vmem:[%s1775_s27 + $0x3c] sm:$0xf] %vm1197_vm3, %v1444_v52  ;;  %v991_v62 = vmin.f32 %v959_v55, 6.0  ;;  %v860_v0 = vmul.f32 0.5, %v800_v57  ;;  %v803_v1 = vadd.f32 %v1560_v42, %v1524_v37  ;;  %v1527_v2 = vpop.f32.mrb[24].mxu1 }
 0x116   : > { %v960_v63 = vmax.f32 %v928_v56, 0.0  ;;  %1211 = vst.msk [vmem:[%s1775_s27 + $0x34] sm:$0xf] %vm1197_vm3, %v1442_v58  ;;  %v958_v4 = vmax.f32 %v926_v60, 0.0  ;;  %v858_v5 = vmul.f32 0.5, %v792_v61  ;;  %v795_v7 = vadd.f32 %v794_v49, %v505_v43  ;;  %v1563_v8 = vpop.f32.mrb[24].mxu0 }
 0x117   : > { %v989_v3 = vmin.f32 %v957_v59, 6.0  ;;  %v518_v6 = vpop.f32.mrb[25].mxu1  ;;  %v1023_v9 = vmul.f32 0.16666667, %v991_v62  ;;  %v899_v12 = vadd.f32 %v1762_v44, %v860_v0  ;;  %v861_v13 = vmul.f32 0.5, %v803_v1  ;;  %v807_v11 = vpop.f32.mrb[25].mxu0 }
 0x118   : > { %v992_v10 = vmin.f32 %v960_v63, 6.0  ;;  %v1528_v14 = vpop.f32.mrb[26].mxu1  ;;  %v990_v16 = vmin.f32 %v958_v4, 6.0  ;;  %v897_v17 = vadd.f32 %v1762_v44, %v858_v5  ;;  %v859_v19 = vmul.f32 0.5, %v795_v7  ;;  %v1564_v18 = vpop.f32.mrb[26].mxu0 }
 0x119   : > { %v1021_v15 = vmul.f32 0.16666667, %v989_v3  ;;  %v521_v20 = vpop.f32.mrb[27].mxu1  ;;  %v1055_v21 = vmul.f32 %v1023_v9, %v895_v34  ;;  %v931_v23 = vadd.f32 3.0, %v899_v12  ;;  %v900_v24 = vadd.f32 %v1762_v44, %v861_v13  ;;  %v810_v25 = vpop.f32.mrb[27].mxu0 }
 0x11a   : > { %v1024_v22 = vmul.f32 0.16666667, %v992_v10  ;;  %v1022_v27 = vmul.f32 0.16666667, %v990_v16  ;;  %v929_v28 = vadd.f32 3.0, %v897_v17  ;;  %v898_v29 = vadd.f32 %v1762_v44, %v859_v19 }
 0x11b   : > { %v1053_v26 = vmul.f32 %v1021_v15, %v893_v40  ;;  %v1447_v30 = vpack.c.bf16 %v1055_v21, %v1055_v21  ;;  %v963_v32 = vmax.f32 %v931_v23, 0.0  ;;  %v932_v33 = vadd.f32 3.0, %v900_v24 }
 0x11c   : > { %v1056_v31 = vmul.f32 %v1024_v22, %v896_v47  ;;  %v1054_v36 = vmul.f32 %v1022_v27, %v894_v54  ;;  %v961_v34 = vmax.f32 %v929_v28, 0.0  ;;  %v930_v37 = vadd.f32 3.0, %v898_v29 }
 0x11d   : > { %v1445_v35 = vpack.c.bf16 %v1053_v26, %v1053_v26  ;;  %1216 = vst.msk [vmem:[%s1775_s27 + $0x48] sm:$0xf] %vm1197_vm3, %v1447_v30  ;;  %v995_v39 = vmin.f32 %v963_v32, 6.0  ;;  %v964_v41 = vmax.f32 %v932_v33, 0.0  ;;  %v816_v40 = vadd.f32 %v1563_v8, %v1527_v2  ;;  %v1531_v42 = vpop.f32.mrb[28].mxu1 }
 0x11e   : > { %v1448_v38 = vpack.c.bf16 %v1056_v31, %v1056_v31  ;;  %v1446_v43 = vpack.c.bf16 %v1054_v36, %v1054_v36  ;;  %v993_v45 = vmin.f32 %v961_v34, 6.0  ;;  %v962_v46 = vmax.f32 %v930_v37, 0.0  ;;  %v1567_v47 = vpop.f32.mrb[28].mxu0  ;;  %v534_v49 = vpop.f32.mrb[29].mxu1 }
 0x11f   : > { %1214 = vst.msk [vmem:[%s1775_s27 + $0x40] sm:$0xf] %vm1197_vm3, %v1445_v35  ;;  %v808_v48 = vadd.f32 %v807_v11, %v518_v6  ;;  %v1027_v50 = vmul.f32 0.16666667, %v995_v39  ;;  %v996_v51 = vmin.f32 %v964_v41, 6.0  ;;  %v864_v53 = vmul.f32 0.5, %v816_v40 }
 0x120   : > { %1217 = vst.msk [vmem:[%s1775_s27 + $0x4c] sm:$0xf] %vm1197_vm3, %v1448_v38  ;;  %v819_v54 = vadd.f32 %v1564_v18, %v1528_v14  ;;  %v823_v52 = vpop.f32.mrb[29].mxu0  ;;  %v1532_v55 = vpop.f32.mrb[30].mxu1  ;;  %1215 = vst.msk [vmem:[%s1775_s27 + $0x44] sm:$0xf] %vm1197_vm3, %v1446_v43  ;;  %v811_v59 = vadd.f32 %v810_v25, %v521_v20  ;;  %v832_v19 = vadd.f32 %v1567_v47, %v1531_v42 }
 0x121   : > { %v1025_v56 = vmul.f32 0.16666667, %v993_v45  ;;  %v994_v57 = vmin.f32 %v962_v46, 6.0  ;;  %v862_v58 = vmul.f32 0.5, %v808_v48  ;;  %v1568_v60 = vpop.f32.mrb[30].mxu0  ;;  %v537_v61 = vpop.f32.mrb[31].mxu1  ;;  %v1059_v62 = vmul.f32 %v1027_v50, %v899_v12 }
 0x122   : > { %v1028_v63 = vmul.f32 0.16666667, %v996_v51  ;;  %v903_v0 = vadd.f32 %v1762_v44, %v864_v53  ;;  %v865_v1 = vmul.f32 0.5, %v819_v54  ;;  %v826_v2 = vpop.f32.mrb[31].mxu0  ;;  %v863_v7 = vmul.f32 0.5, %v811_v59 }
 0x123   : > { %v1057_v3 = vmul.f32 %v1025_v56, %v897_v17  ;;  %v1026_v4 = vmul.f32 0.16666667, %v994_v57  ;;  %v901_v5 = vadd.f32 %v1762_v44, %v862_v58  ;;  %v1451_v8 = vpack.c.bf16 %v1059_v62, %v1059_v62 }
 0x124   : > { %v1060_v6 = vmul.f32 %v1028_v63, %v900_v24  ;;  %v935_v9 = vadd.f32 3.0, %v903_v0  ;;  %v904_v10 = vadd.f32 %v1762_v44, %v865_v1  ;;  %v902_v14 = vadd.f32 %v1762_v44, %v863_v7 }
 0x125   : > { %v1449_v13 = vpack.c.bf16 %v1057_v3, %v1057_v3  ;;  %v1058_v12 = vmul.f32 %v1026_v4, %v898_v29  ;;  %v933_v11 = vadd.f32 3.0, %v901_v5  ;;  %1220 = vst.msk [vmem:[%s1775_s27 + $0x58] sm:$0xf] %vm1197_vm3, %v1451_v8  ;;  %v824_v22 = vadd.f32 %v823_v52, %v534_v49 }
 0x126   : > { %v1452_v15 = vpack.c.bf16 %v1060_v6, %v1060_v6  ;;  %v967_v16 = vmax.f32 %v935_v9, 0.0  ;;  %v936_v17 = vadd.f32 3.0, %v904_v10  ;;  %v934_v21 = vadd.f32 3.0, %v902_v14 }
 0x127   : > { %1218 = vst.msk [vmem:[%s1775_s27 + $0x50] sm:$0xf] %vm1197_vm3, %v1449_v13  ;;  %v1450_v18 = vpack.c.bf16 %v1058_v12, %v1058_v12  ;;  %v965_v20 = vmax.f32 %v933_v11, 0.0  ;;  %v868_v25 = vmul.f32 0.5, %v832_v19  ;;  %v835_v26 = vadd.f32 %v1568_v60, %v1532_v55 }
 0x128   : > { %1221 = vst.msk [vmem:[%s1775_s27 + $0x5c] sm:$0xf] %vm1197_vm3, %v1452_v15  ;;  %v999_v23 = vmin.f32 %v967_v16, 6.0  ;;  %v968_v24 = vmax.f32 %v936_v17, 0.0  ;;  %v966_v28 = vmax.f32 %v934_v21, 0.0  ;;  %v866_v29 = vmul.f32 0.5, %v824_v22 }
 0x129   : > { %1219 = vst.msk [vmem:[%s1775_s27 + $0x54] sm:$0xf] %vm1197_vm3, %v1450_v18  ;;  %v997_v27 = vmin.f32 %v965_v20, 6.0  ;;  %v827_v30 = vadd.f32 %v826_v2, %v537_v61  ;;  %v907_v33 = vadd.f32 %v1762_v44, %v868_v25  ;;  %v869_v35 = vmul.f32 0.5, %v835_v26 }
 0x12a   : > { %v1031_v31 = vmul.f32 0.16666667, %v999_v23  ;;  %v1000_v32 = vmin.f32 %v968_v24, 6.0  ;;  %v998_v34 = vmin.f32 %v966_v28, 6.0  ;;  %v905_v37 = vadd.f32 %v1762_v44, %v866_v29 }
 0x12b   : > { %v1029_v36 = vmul.f32 0.16666667, %v997_v27  ;;  %v867_v38 = vmul.f32 0.5, %v827_v30  ;;  %v939_v40 = vadd.f32 3.0, %v907_v33  ;;  %v908_v42 = vadd.f32 %v1762_v44, %v869_v35 }
 0x12c   : > { %v1063_v39 = vmul.f32 %v1031_v31, %v903_v0  ;;  %v1032_v41 = vmul.f32 0.16666667, %v1000_v32  ;;  %v1030_v45 = vmul.f32 0.16666667, %v998_v34  ;;  %v937_v46 = vadd.f32 3.0, %v905_v37 }
 0x12d   : > { %v1061_v43 = vmul.f32 %v1029_v36, %v901_v5  ;;  %v906_v48 = vadd.f32 %v1762_v44, %v867_v38  ;;  %v971_v50 = vmax.f32 %v939_v40, 0.0  ;;  %v940_v51 = vadd.f32 3.0, %v908_v42 }
 0x12e   : > { %v1455_v47 = vpack.c.bf16 %v1063_v39, %v1063_v39  ;;  %v1064_v49 = vmul.f32 %v1032_v41, %v904_v10  ;;  %v1062_v54 = vmul.f32 %v1030_v45, %v902_v14  ;;  %v969_v52 = vmax.f32 %v937_v46, 0.0 }
 0x12f   : > { %v1453_v53 = vpack.c.bf16 %v1061_v43, %v1061_v43  ;;  %v938_v55 = vadd.f32 3.0, %v906_v48  ;;  %v1003_v57 = vmin.f32 %v971_v50, 6.0  ;;  %v972_v58 = vmax.f32 %v940_v51, 0.0 }
 0x130   : > { %1224 = vst.msk [vmem:[%s1775_s27 + $0x68] sm:$0xf] %vm1197_vm3, %v1455_v47  ;;  %v1456_v56 = vpack.c.bf16 %v1064_v49, %v1064_v49  ;;  %v1454_v59 = vpack.c.bf16 %v1062_v54, %v1062_v54  ;;  %v1001_v60 = vmin.f32 %v969_v52, 6.0 }
 0x131   : > { %1222 = vst.msk [vmem:[%s1775_s27 + $0x60] sm:$0xf] %vm1197_vm3, %v1453_v53  ;;  %v970_v44 = vmax.f32 %v938_v55, 0.0  ;;  %v1035_v61 = vmul.f32 0.16666667, %v1003_v57  ;;  %v1004_v62 = vmin.f32 %v972_v58, 6.0 }
 0x132   : > { %1225 = vst.msk [vmem:[%s1775_s27 + $0x6c] sm:$0xf] %vm1197_vm3, %v1456_v56  ;;  %1223 = vst.msk [vmem:[%s1775_s27 + $0x64] sm:$0xf] %vm1197_vm3, %v1454_v59  ;;  %v1033_v63 = vmul.f32 0.16666667, %v1001_v60 }
 0x133   : > { %v1002_v0 = vmin.f32 %v970_v44, 6.0  ;;  %v1067_v1 = vmul.f32 %v1035_v61, %v907_v33  ;;  %v1036_v2 = vmul.f32 0.16666667, %v1004_v62 }
 0x134   : > { %v1065_v3 = vmul.f32 %v1033_v63, %v905_v37 }
 0x135   : > { %v1034_v4 = vmul.f32 0.16666667, %v1002_v0  ;;  %v1459_v5 = vpack.c.bf16 %v1067_v1, %v1067_v1  ;;  %v1068_v7 = vmul.f32 %v1036_v2, %v908_v42 }
 0x136   : > { %v1457_v8 = vpack.c.bf16 %v1065_v3, %v1065_v3 }
 0x137   : > { %v1066_v6 = vmul.f32 %v1034_v4, %v906_v48  ;;  %1228 = vst.msk [vmem:[%s1775_s27 + $0x78] sm:$0xf] %vm1197_vm3, %v1459_v5  ;;  %v1460_v9 = vpack.c.bf16 %v1068_v7, %v1068_v7 }
 0x138   : > { %1226 = vst.msk [vmem:[%s1775_s27 + $0x70] sm:$0xf] %vm1197_vm3, %v1457_v8 }
 0x139   : > { %v1458_v10 = vpack.c.bf16 %v1066_v6, %v1066_v6  ;;  %1229 = vst.msk [vmem:[%s1775_s27 + $0x7c] sm:$0xf] %vm1197_vm3, %v1460_v9 }
 0x13b   : > { %1227 = vst.msk [vmem:[%s1775_s27 + $0x74] sm:$0xf] %vm1197_vm3, %v1458_v10 }
 0x13c PF: > { %s13_s12 = sadd.s32 1, %s1650_s12  }
 0x13d   : > { %p10_p4 = scmp.ge.s32.totalorder %s13_s12, 10  }
 0x13f   :  { %12 = sbr.rel (!%p10_p4) target bundleno = 1 (0x1), region = 63 }

</bundles_post_ra>
